<compile_context>
chip_gen: v6e
topology: v6e:2x2x1
jax: 0.10.0
libtpu: 0.0.40
codegen_flags: <defaults>
</compile_context>

<pallas_src>
import functools

import jax
import jax.numpy as jnp
from jax.experimental import pallas as pl
from jax.experimental.pallas import tpu as pltpu


def _round_up(x, m):
    return (x + m - 1) // m * m


_NEG_BIG = -1e30  # finite "minus infinity" for padded vocab columns


def _linear_logsoftmax_kernel(x_ref, w_ref, b_ref, o_ref, m_sc, l_sc, stash_sc):
    """One (row-tile, vocab-tile) grid step.

    x_ref:    (tm, D)        input rows (native dtype, fed straight to the MXU)
    w_ref:    (D, tv)        pre-transposed weight tile (native dtype)
    b_ref:    (1, tv)        bias tile (f32)
    o_ref:    (tm, V_pad)    output block, resident across the vocab axis
    m_sc:     (tm, 1)        running max       (f32 VMEM scratch)
    l_sc:     (tm, 1)        running sum-exp   (f32 VMEM scratch)
    stash_sc: (nvt, tm, tv)  raw f32 logits stash (f32 VMEM scratch)
    """
    j = pl.program_id(1)
    nvt = stash_sc.shape[0]
    tv = w_ref.shape[1]

    @pl.when(j == 0)
    def _init():
        m_sc[...] = jnp.full_like(m_sc, -jnp.inf)
        l_sc[...] = jnp.zeros_like(l_sc)

    # MXU consumes the native dtype directly (bf16/f32); accumulate in f32.
    logits = jnp.dot(x_ref[...], w_ref[...], preferred_element_type=jnp.float32)
    logits = logits + b_ref[...]

    # Stash raw logits for the final normalization at the last vocab tile.
    stash_sc[j] = logits

    # Online log-sum-exp across vocab tiles.
    m_prev = m_sc[...]
    m_new = jnp.maximum(m_prev, jnp.max(logits, axis=-1, keepdims=True))
    l_sc[...] = l_sc[...] * jnp.exp(m_prev - m_new) + jnp.sum(
        jnp.exp(logits - m_new), axis=-1, keepdims=True)
    m_sc[...] = m_new

    @pl.when(j == nvt - 1)
    def _finalize():
        lse = m_sc[...] + jnp.log(l_sc[...])
        # Static, lane-dense stores of the full (tm, V_pad) row block.
        for k in range(nvt):
            o_ref[:, k * tv:(k + 1) * tv] = (stash_sc[k] - lse).astype(o_ref.dtype)


def prepare_params(weight, bias, *, tv=512):
    """One-time parameter prep (do at module init, NOT per forward call).

    Transposes the torch-style (V, D) weight to (D, V) and pads the vocab axis
    to a multiple of the vocab tile.  Padded columns get weight 0 and bias
    -1e30 so they contribute exactly 0 to the log-sum-exp.
    Returns (w_t, b_padded, vocab_size, tv).
    """
    V, D = weight.shape
    tv = max(128, _round_up(min(int(tv), _round_up(V, 128)), 128))
    V_pad = _round_up(V, tv)
    w_t = jnp.zeros((D, V_pad), weight.dtype).at[:, :V].set(weight.T)
    b = jnp.full((1, V_pad), _NEG_BIG, jnp.float32)
    b = b.at[:, :V].set(bias.astype(jnp.float32)[None, :])
    return w_t, b, int(V), int(tv)


@functools.partial(jax.jit, static_argnames=("vocab_size", "tm", "tv"))
def vocab_output_softmax(x, w_t, b, *, vocab_size, tm=128, tv=512):
    """x: (B, S, D).  w_t: (D, V_pad) prepared weight.  b: (1, V_pad) prepared
    bias.  Returns (B, S, vocab_size) log-probabilities, matching
    LogSoftmax(Linear(x))."""
    B, S, D = x.shape
    V_pad = w_t.shape[1]
    assert V_pad % tv == 0, "tv must match the tile used in prepare_params"
    nvt = V_pad // tv

    M = B * S
    M_pad = _round_up(M, tm)
    x2d = x.reshape(M, D)
    if M_pad != M:
        x2d = jnp.pad(x2d, ((0, M_pad - M), (0, 0)))

    # TODO(synk): for very large vocabularies (V_pad * tm * 4B stash + resident
    # output block exceeding ~32 MiB on v7x) switch to a two-pass normalization
    # instead of the full-width VMEM stash.
    bytes_needed = (
        2 * tm * D * x.dtype.itemsize          # x tile (double-buffered)
        + 2 * D * tv * w_t.dtype.itemsize      # weight tile (double-buffered)
        + 2 * tv * 4                           # bias tile
        + tm * V_pad * x.dtype.itemsize        # resident output block
        + nvt * tm * tv * 4                    # f32 logits stash
        + 2 * tm * 4                           # m / l scratch
    )
    vmem_limit = int(bytes_needed * 1.25) if bytes_needed > (16 << 20) else None

    out2d = pl.pallas_call(
        _linear_logsoftmax_kernel,
        out_shape=jax.ShapeDtypeStruct((M_pad, V_pad), x.dtype),
        grid_spec=pltpu.PrefetchScalarGridSpec(
            num_scalar_prefetch=0,
            grid=(M_pad // tm, nvt),                       # vocab (reduction) last
            in_specs=[
                pl.BlockSpec((tm, D), lambda i, j: (i, 0)),   # row tile of inputs
                pl.BlockSpec((D, tv), lambda i, j: (0, j)),   # weight tile
                pl.BlockSpec((1, tv), lambda i, j: (0, j)),   # bias tile
            ],
            # Output block stays resident across the vocab axis; written once,
            # fully, at the last vocab tile.
            out_specs=pl.BlockSpec((tm, V_pad), lambda i, j: (i, 0)),
            scratch_shapes=[
                pltpu.VMEM((tm, 1), jnp.float32),         # running max
                pltpu.VMEM((tm, 1), jnp.float32),         # running sum-exp
                pltpu.VMEM((nvt, tm, tv), jnp.float32),   # raw logits stash
            ],
        ),
        compiler_params=pltpu.CompilerParams(
            dimension_semantics=("parallel", "arbitrary"),
            vmem_limit_bytes=vmem_limit,
        ),
    )(x2d, w_t, b)

    return out2d[:M, :vocab_size].reshape(B, S, vocab_size)


if __name__ == "__main__":
    # Small shapes consistent with the module's forward.  vocab=300 / rows=16
    # deliberately exercise the vocab-tiling (3 tiles, last one padded) and the
    # row-padding path (16 -> 128 rows).
    batch, seq, embed_dim, vocab = 2, 8, 32, 300

    key = jax.random.PRNGKey(0)
    kx, kw, kb = jax.random.split(key, 3)

    # Deterministic parameter init (mimics nn.Linear's uniform bound).
    bound = 1.0 / (embed_dim ** 0.5)
    weight = jax.random.uniform(kw, (vocab, embed_dim), jnp.float32, -bound, bound)
    bias = jax.random.uniform(kb, (vocab,), jnp.float32, -bound, bound)
    x = jax.random.normal(kx, (batch, seq, embed_dim), jnp.float32)

    # One-time parameter prep (== module init): transpose + vocab padding.
    w_t, b_pad, V, tv = prepare_params(weight, bias, tv=128)

    out = vocab_output_softmax(x, w_t, b_pad, vocab_size=V, tm=128, tv=tv)
    out = jax.block_until_ready(out)

    # Sanity check against plain-JAX reference.
    ref = jax.nn.log_softmax(x @ weight.T + bias, axis=-1)
    assert out.shape == (batch, seq, vocab)
    assert jnp.allclose(out, ref, atol=1e-4, rtol=1e-4), "mismatch vs reference"

    print("KERNEL_OK")
</pallas_src>

<mosaic_0001>
module attributes {stable_mosaic.version = 11 : i64} {
  func.func @_linear_logsoftmax_kernel(%arg0: i32, %arg1: i32, %arg2: memref<128x32xf32, #tpu.memory_space<vmem>>, %arg3: memref<32x128xf32, #tpu.memory_space<vmem>>, %arg4: memref<1x128xf32, #tpu.memory_space<vmem>>, %arg5: memref<128x384xf32, #tpu.memory_space<vmem>>, %arg6: memref<128x1xf32, #tpu.memory_space<vmem>>, %arg7: memref<128x1xf32, #tpu.memory_space<vmem>>, %arg8: memref<3x128x128xf32, #tpu.memory_space<vmem>>) attributes {dimension_semantics = [#tpu.dimension_semantics<parallel>, #tpu.dimension_semantics<arbitrary>], iteration_bounds = array<i64: 1, 3>, scalar_prefetch = 0 : i64, scratch_operands = 3 : i64, tpu.core_type = #tpu.core_type<tc>, window_params = [{transform_indices = @transform_0, window_bounds = array<i64: 128, 32>}, {transform_indices = @transform_1, window_bounds = array<i64: 32, 128>}, {transform_indices = @transform_2, window_bounds = array<i64: 1, 128>}, {transform_indices = @transform_3, window_bounds = array<i64: 128, 384>}]} {
    %c0_i32 = arith.constant 0 : i32
    %0 = arith.cmpi eq, %arg1, %c0_i32 : i32
    %1 = arith.extui %0 : i1 to i32
    %c0_i32_0 = arith.constant 0 : i32
    %2 = arith.cmpi ne, %1, %c0_i32_0 : i32
    scf.if %2 {
      %cst_19 = arith.constant 0xFF800000 : f32
      %32 = vector.broadcast %cst_19 : f32 to vector<128x1xf32>
      %c0_20 = arith.constant 0 : index
      %c0_21 = arith.constant 0 : index
      %33 = vector.load %arg6[%c0_20, %c0_21] : memref<128x1xf32, #tpu.memory_space<vmem>>, vector<128x1xf32>
      tpu.vector_store %arg6[%c0_20, %c0_21], %32 {strides = array<i32>} : memref<128x1xf32, #tpu.memory_space<vmem>>, vector<128x1xf32>,
      %cst_22 = arith.constant 0.000000e+00 : f32
      %34 = vector.broadcast %cst_22 : f32 to vector<128x1xf32>
      %c0_23 = arith.constant 0 : index
      %c0_24 = arith.constant 0 : index
      %35 = vector.load %arg7[%c0_23, %c0_24] : memref<128x1xf32, #tpu.memory_space<vmem>>, vector<128x1xf32>
      tpu.vector_store %arg7[%c0_23, %c0_24], %34 {strides = array<i32>} : memref<128x1xf32, #tpu.memory_space<vmem>>, vector<128x1xf32>,
    } else {
    }
    %c0 = arith.constant 0 : index
    %c0_1 = arith.constant 0 : index
    %3 = vector.load %arg2[%c0, %c0_1] : memref<128x32xf32, #tpu.memory_space<vmem>>, vector<128x32xf32>
    %c0_2 = arith.constant 0 : index
    %c0_3 = arith.constant 0 : index
    %4 = vector.load %arg3[%c0_2, %c0_3] : memref<32x128xf32, #tpu.memory_space<vmem>>, vector<32x128xf32>
    %cst = arith.constant dense<0.000000e+00> : vector<128x128xf32>
    %5 = tpu.matmul %3, %4, %cst {dimension_numbers = #tpu.dot_dimension_numbers<[1], [0], [0], [1], [0, 0, 1, 1], [], []>} : vector<128x32xf32>, vector<32x128xf32>, vector<128x128xf32> -> vector<128x128xf32>
    %c0_4 = arith.constant 0 : index
    %c0_5 = arith.constant 0 : index
    %6 = vector.load %arg4[%c0_4, %c0_5] : memref<1x128xf32, #tpu.memory_space<vmem>>, vector<1x128xf32>
    %7 = vector.broadcast %6 : vector<1x128xf32> to vector<128x128xf32>
    %8 = arith.addf %5, %7 : vector<128x128xf32>
    %9 = arith.index_cast %arg1 : i32 to index
    %c0_6 = arith.constant 0 : index
    %c0_7 = arith.constant 0 : index
    %10 = vector.load %arg8[%9, %c0_6, %c0_7] : memref<3x128x128xf32, #tpu.memory_space<vmem>>, vector<1x128x128xf32>
    %11 = vector.shape_cast %10 : vector<1x128x128xf32> to vector<128x128xf32>
    %12 = vector.shape_cast %8 : vector<128x128xf32> to vector<1x128x128xf32>
    tpu.vector_store %arg8[%9, %c0_6, %c0_7], %12 {strides = array<i32>} : memref<3x128x128xf32, #tpu.memory_space<vmem>>, vector<1x128x128xf32>,
    %c0_8 = arith.constant 0 : index
    %c0_9 = arith.constant 0 : index
    %13 = vector.load %arg6[%c0_8, %c0_9] : memref<128x1xf32, #tpu.memory_space<vmem>>, vector<128x1xf32>
    %cst_10 = arith.constant dense<0xFF800000> : vector<128xf32>
    %14 = vector.multi_reduction <maximumf>, %8, %cst_10 [1] : vector<128x128xf32> to vector<128xf32>
    %15 = vector.shape_cast %14 : vector<128xf32> to vector<128x1xf32>
    %16 = arith.maximumf %13, %15 : vector<128x1xf32>
    %c0_11 = arith.constant 0 : index
    %c0_12 = arith.constant 0 : index
    %17 = vector.load %arg7[%c0_11, %c0_12] : memref<128x1xf32, #tpu.memory_space<vmem>>, vector<128x1xf32>
    %18 = arith.subf %13, %16 : vector<128x1xf32>
    %19 = math.exp %18 : vector<128x1xf32>
    %20 = arith.mulf %17, %19 : vector<128x1xf32>
    %21 = vector.broadcast %16 : vector<128x1xf32> to vector<128x128xf32>
    %22 = arith.subf %8, %21 : vector<128x128xf32>
    %23 = math.exp %22 : vector<128x128xf32>
    %cst_13 = arith.constant dense<0.000000e+00> : vector<128xf32>
    %24 = vector.multi_reduction <add>, %23, %cst_13 [1] : vector<128x128xf32> to vector<128xf32>
    %25 = vector.shape_cast %24 : vector<128xf32> to vector<128x1xf32>
    %26 = arith.addf %20, %25 : vector<128x1xf32>
    %c0_14 = arith.constant 0 : index
    %c0_15 = arith.constant 0 : index
    %27 = vector.load %arg7[%c0_14, %c0_15] : memref<128x1xf32, #tpu.memory_space<vmem>>, vector<128x1xf32>
    tpu.vector_store %arg7[%c0_14, %c0_15], %26 {strides = array<i32>} : memref<128x1xf32, #tpu.memory_space<vmem>>, vector<128x1xf32>,
    %c0_16 = arith.constant 0 : index
    %c0_17 = arith.constant 0 : index
    %28 = vector.load %arg6[%c0_16, %c0_17] : memref<128x1xf32, #tpu.memory_space<vmem>>, vector<128x1xf32>
    tpu.vector_store %arg6[%c0_16, %c0_17], %16 {strides = array<i32>} : memref<128x1xf32, #tpu.memory_space<vmem>>, vector<128x1xf32>,
    %c2_i32 = arith.constant 2 : i32
    %29 = arith.cmpi eq, %arg1, %c2_i32 : i32
    %30 = arith.extui %29 : i1 to i32
    %c0_i32_18 = arith.constant 0 : i32
    %31 = arith.cmpi ne, %30, %c0_i32_18 : i32
    scf.if %31 {
      %c0_19 = arith.constant 0 : index
      %c0_20 = arith.constant 0 : index
      %32 = vector.load %arg6[%c0_19, %c0_20] : memref<128x1xf32, #tpu.memory_space<vmem>>, vector<128x1xf32>
      %c0_21 = arith.constant 0 : index
      %c0_22 = arith.constant 0 : index
      %33 = vector.load %arg7[%c0_21, %c0_22] : memref<128x1xf32, #tpu.memory_space<vmem>>, vector<128x1xf32>
      %34 = math.log %33 : vector<128x1xf32>
      %35 = arith.addf %32, %34 : vector<128x1xf32>
      %c0_23 = arith.constant 0 : index
      %c0_24 = arith.constant 0 : index
      %c0_25 = arith.constant 0 : index
      %36 = vector.load %arg8[%c0_23, %c0_24, %c0_25] : memref<3x128x128xf32, #tpu.memory_space<vmem>>, vector<1x128x128xf32>
      %37 = vector.shape_cast %36 : vector<1x128x128xf32> to vector<128x128xf32>
      %38 = vector.broadcast %35 : vector<128x1xf32> to vector<128x128xf32>
      %39 = arith.subf %37, %38 : vector<128x128xf32>
      %c0_26 = arith.constant 0 : index
      %c0_27 = arith.constant 0 : index
      %40 = vector.load %arg5[%c0_26, %c0_27] : memref<128x384xf32, #tpu.memory_space<vmem>>, vector<128x128xf32>
      tpu.vector_store %arg5[%c0_26, %c0_27], %39 {strides = array<i32>} : memref<128x384xf32, #tpu.memory_space<vmem>>, vector<128x128xf32>,
      %c1 = arith.constant 1 : index
      %c0_28 = arith.constant 0 : index
      %c0_29 = arith.constant 0 : index
      %41 = vector.load %arg8[%c1, %c0_28, %c0_29] : memref<3x128x128xf32, #tpu.memory_space<vmem>>, vector<1x128x128xf32>
      %42 = vector.shape_cast %41 : vector<1x128x128xf32> to vector<128x128xf32>
      %43 = vector.broadcast %35 : vector<128x1xf32> to vector<128x128xf32>
      %44 = arith.subf %42, %43 : vector<128x128xf32>
      %c0_30 = arith.constant 0 : index
      %c128 = arith.constant 128 : index
      %45 = vector.load %arg5[%c0_30, %c128] : memref<128x384xf32, #tpu.memory_space<vmem>>, vector<128x128xf32>
      tpu.vector_store %arg5[%c0_30, %c128], %44 {strides = array<i32>} : memref<128x384xf32, #tpu.memory_space<vmem>>, vector<128x128xf32>,
      %c2 = arith.constant 2 : index
      %c0_31 = arith.constant 0 : index
      %c0_32 = arith.constant 0 : index
      %46 = vector.load %arg8[%c2, %c0_31, %c0_32] : memref<3x128x128xf32, #tpu.memory_space<vmem>>, vector<1x128x128xf32>
      %47 = vector.shape_cast %46 : vector<1x128x128xf32> to vector<128x128xf32>
      %48 = vector.broadcast %35 : vector<128x1xf32> to vector<128x128xf32>
      %49 = arith.subf %47, %48 : vector<128x128xf32>
      %c0_33 = arith.constant 0 : index
      %c256 = arith.constant 256 : index
      %50 = vector.load %arg5[%c0_33, %c256] : memref<128x384xf32, #tpu.memory_space<vmem>>, vector<128x128xf32>
      tpu.vector_store %arg5[%c0_33, %c256], %49 {strides = array<i32>} : memref<128x384xf32, #tpu.memory_space<vmem>>, vector<128x128xf32>,
    } else {
    }
    return
  }
  func.func @transform_0(%arg0: i32, %arg1: i32) -> (i32, i32) {
    %c0_i32 = arith.constant 0 : i32
    %c0_i32_0 = arith.constant 0 : i32
    return %arg0, %c0_i32 : i32, i32
  }
  func.func @transform_1(%arg0: i32, %arg1: i32) -> (i32, i32) {
    %c0_i32 = arith.constant 0 : i32
    %c0_i32_0 = arith.constant 0 : i32
    return %c0_i32, %arg1 : i32, i32
  }
  func.func @transform_2(%arg0: i32, %arg1: i32) -> (i32, i32) {
    %c0_i32 = arith.constant 0 : i32
    %c0_i32_0 = arith.constant 0 : i32
    return %c0_i32, %arg1 : i32, i32
  }
  func.func @transform_3(%arg0: i32, %arg1: i32) -> (i32, i32) {
    %c0_i32 = arith.constant 0 : i32
    %c0_i32_0 = arith.constant 0 : i32
    return %arg0, %c0_i32 : i32, i32
  }
}

</mosaic_0001>

<bundles_post_ra>
// kernel: vocab_output_softmax.1
= control target key start
LH: loop header
LB: loop body
LE: loop exit
PB: predicated region body
PF: predicated region fallthrough
CT: control target
= control target key end

     0   :  { %s1604_s12 = smov 0   ;;  %s1606_s13 = smov 0   ;;  %s2249_s0 = inlined_call_operand.vmem [shape: f32[128,32], index: 0, kind: input, shape index: {}]   ;;  %s2250_s1 = inlined_call_operand.vmem [shape: f32[32,384], index: 1, kind: input, shape index: {}]   ;;  %s2251_s2 = inlined_call_operand.vmem [shape: f32[1,384], index: 2, kind: input, shape index: {}]   ;;  %s2252_s3 = inlined_call_operand.vmem [shape: f32[128,384], index: 3, kind: output, shape index: {}]  }
   0x1   :  { %s1608_s14 = smov 0   ;;  %s1610_s15 = smov 0  }
   0x2   :  { %s1612_s16 = smov 0  }
   0x3 LB: > { %s22_s17 = sadd.s32 1, %s1574_s15  ;;  %p65_p1 = scmp.ne.s32.totalorder %s1566_s13, %s1562_s12  ;;  %s1578_s16 = sphi %s1612_s16, %s13_s16   ;;  %s1574_s15 = sphi %s1610_s15, %s2271_s15   ;;  %s1570_s14 = sphi %s1608_s14, %s2270_s14   ;;  %s1566_s13 = sphi %s1606_s13, %s2269_s13   ;;  %s1562_s12 = sphi %s1604_s12, %s2268_s12  }
   0x4   : > { %p23_p0 = scmp.ge.s32.totalorder %s22_s17, 3  ;;  %p66_p2 = scmp.eq.s32.totalorder %s1578_s16, 0 }
   0x5   : > { %s58_s19 = sadd.s32 1, %s1566_s13  ;;  %p1307_p5 = scmp.ge.s32.totalorder %s1578_s16, 3 }
   0x6   : > { %s2273_s17 = smov (%p23_p0, %s22_s17), 0  ;;  %p67_p3 = por %p66_p2, %p65_p1 }
   0x7   : > { %s55_s18 = ssub.s32 %s1574_s15, %s2273_s17  ;;  %152 = sbr.rel (%p1307_p5) target bundleno = 18 (0x12), region = 20 }
   0x8   : > { %p56_p4 = scmp.eq.s32.totalorder %s55_s18, 0 }
   0xa   : > { %s1639_s20 = scalar_select %p56_p4, %s1566_s13, %s58_s19  }
   0xc   : > { %155 = sbr.rel (!%p67_p3) target bundleno = 18 (0x12), region = 24  ;;  %s157_s21 = sand.u32 (%p67_p3), 1, %s1566_s13  }
   0xd   : > { %s1309_s22 = sshll.u32 (%p67_p3), %s1574_s15, 3  ;;  %s1308_s23 = sshll.u32 (%p67_p3), %s157_s21, 5 }
   0xe   : > { %s161_s26 = scalar_lea.vmem (%p67_p3), %s2250_s1, %s1309_s22  ;;  %s159_s27 = scalar_lea.vmem (%p67_p3), [#allocation5], %s1308_s23 }
   0xf   : > { %v196_v0 = vld [vmem:[%s161_s26] sm:$0xff] (%p67_p3)  ;;  %v198_v1 = vld [vmem:[%s161_s26 + $0x18] sm:$0xff] (%p67_p3)  ;;  %v200_v2 = vld [vmem:[%s161_s26 + $0x30] sm:$0xff] (%p67_p3) }
  0x10   : > { %197 = vst [vmem:[%s159_s27] sm:$0xff] (%p67_p3), %v196_v0  ;;  %199 = vst [vmem:[%s159_s27 + $0x8] sm:$0xff] (%p67_p3), %v198_v1  ;;  %v202_v3 = vld [vmem:[%s161_s26 + $0x48] sm:$0xff] (%p67_p3) }
  0x11   : > { %201 = vst [vmem:[%s159_s27 + $0x10] sm:$0xff] %v200_v2  ;;  %203 = vst [vmem:[%s159_s27 + $0x18] sm:$0xff] %v202_v3 }
  0x12 PF: > { %p1310_p6 = scmp.ge.s32.totalorder %s1578_s16, 1  ;;  %p214_p7 = scmp.lt.s32.totalorder %s1578_s16, 4 }
  0x14   : > { %p215_p8 = pnand %p1310_p6, %p214_p7 }
  0x15   : > { %s221_s28 = sand.u32 (!%p215_p8), 1, %s1562_s12   ;;  %p259_p9 = scmp.lt.s32.totalorder (!%p215_p8), %s1570_s14, 2 }
  0x16   : > { %218 = sbr.rel (%p215_p8) target bundleno = 898 (0x382), region = 66  ;;  %s1311_s29 = sshll.u32 (!%p215_p8), %s221_s28, 5 }
  0x17   : > { %s1658_s7 = scalar_lea.vmem (!%p215_p8), [#allocation5], %s1311_s29  ;;  %p1312_p10 = scmp.ne.s32.totalorder (!%p215_p8), %s1570_s14, 0 }
  0x1b   : > { %s1652_s30 = scalar_select %p259_p9, %s1570_s14, 2 }
  0x1c   : > { %272 = sbr.rel (%p1312_p10) target bundleno = 50 (0x32), region = 74 }
  0x1d   : > { %s261_s6 = scalar_lea.vmem %s2251_s2, %s1652_s30 }
  0x21   : > { %vm273_vm0 = vcmask 7168   ;;  %v1580_v4 = vmov -inf   ;;  %v1581_v5 = vmov 0.0  }
  0x22   : > { %274 = vst.msk [vmem:[#allocation2] sm:$0xff] %vm273_vm0, %v1580_v4  ;;  %275 = vst.msk [vmem:[#allocation2 + $0x8] sm:$0xff] %vm273_vm0, %v1580_v4 }
  0x23   : > { %276 = vst.msk [vmem:[#allocation2 + $0x10] sm:$0xff] %vm273_vm0, %v1580_v4  ;;  %277 = vst.msk [vmem:[#allocation2 + $0x18] sm:$0xff] %vm273_vm0, %v1580_v4 }
  0x24   : > { %278 = vst.msk [vmem:[#allocation2 + $0x20] sm:$0xff] %vm273_vm0, %v1580_v4  ;;  %279 = vst.msk [vmem:[#allocation2 + $0x28] sm:$0xff] %vm273_vm0, %v1580_v4 }
  0x25   : > { %280 = vst.msk [vmem:[#allocation2 + $0x30] sm:$0xff] %vm273_vm0, %v1580_v4  ;;  %281 = vst.msk [vmem:[#allocation2 + $0x38] sm:$0xff] %vm273_vm0, %v1580_v4 }
  0x26   : > { %282 = vst.msk [vmem:[#allocation2 + $0x40] sm:$0xff] %vm273_vm0, %v1580_v4  ;;  %283 = vst.msk [vmem:[#allocation2 + $0x48] sm:$0xff] %vm273_vm0, %v1580_v4 }
  0x27   : > { %284 = vst.msk [vmem:[#allocation2 + $0x50] sm:$0xff] %vm273_vm0, %v1580_v4  ;;  %285 = vst.msk [vmem:[#allocation2 + $0x58] sm:$0xff] %vm273_vm0, %v1580_v4 }
  0x28   : > { %286 = vst.msk [vmem:[#allocation2 + $0x60] sm:$0xff] %vm273_vm0, %v1580_v4  ;;  %287 = vst.msk [vmem:[#allocation2 + $0x68] sm:$0xff] %vm273_vm0, %v1580_v4 }
  0x29   : > { %288 = vst.msk [vmem:[#allocation2 + $0x70] sm:$0xff] %vm273_vm0, %v1580_v4  ;;  %289 = vst.msk [vmem:[#allocation2 + $0x78] sm:$0xff] %vm273_vm0, %v1580_v4 }
  0x2a   : > { %290 = vst.msk [vmem:[#allocation3] sm:$0xff] %vm273_vm0, %v1581_v5  ;;  %291 = vst.msk [vmem:[#allocation3 + $0x8] sm:$0xff] %vm273_vm0, %v1581_v5 }
  0x2b   : > { %292 = vst.msk [vmem:[#allocation3 + $0x10] sm:$0xff] %vm273_vm0, %v1581_v5  ;;  %293 = vst.msk [vmem:[#allocation3 + $0x18] sm:$0xff] %vm273_vm0, %v1581_v5 }
  0x2c   : > { %294 = vst.msk [vmem:[#allocation3 + $0x20] sm:$0xff] %vm273_vm0, %v1581_v5  ;;  %295 = vst.msk [vmem:[#allocation3 + $0x28] sm:$0xff] %vm273_vm0, %v1581_v5 }
  0x2d   : > { %296 = vst.msk [vmem:[#allocation3 + $0x30] sm:$0xff] %vm273_vm0, %v1581_v5  ;;  %297 = vst.msk [vmem:[#allocation3 + $0x38] sm:$0xff] %vm273_vm0, %v1581_v5 }
  0x2e   : > { %298 = vst.msk [vmem:[#allocation3 + $0x40] sm:$0xff] %vm273_vm0, %v1581_v5  ;;  %299 = vst.msk [vmem:[#allocation3 + $0x48] sm:$0xff] %vm273_vm0, %v1581_v5 }
  0x2f   : > { %300 = vst.msk [vmem:[#allocation3 + $0x50] sm:$0xff] %vm273_vm0, %v1581_v5  ;;  %301 = vst.msk [vmem:[#allocation3 + $0x58] sm:$0xff] %vm273_vm0, %v1581_v5 }
  0x30   : > { %302 = vst.msk [vmem:[#allocation3 + $0x60] sm:$0xff] %vm273_vm0, %v1581_v5  ;;  %303 = vst.msk [vmem:[#allocation3 + $0x68] sm:$0xff] %vm273_vm0, %v1581_v5 }
  0x31   : > { %304 = vst.msk [vmem:[#allocation3 + $0x70] sm:$0xff] %vm273_vm0, %v1581_v5  ;;  %305 = vst.msk [vmem:[#allocation3 + $0x78] sm:$0xff] %vm273_vm0, %v1581_v5 }
  0x32 PF: > { %v325_v6 = vld [vmem:[%s1658_s7 + $0x18] sm:$0xff]  ;;  %v324_v7 = vld [vmem:[%s1658_s7 + $0x10] sm:$0xff]  ;;  %v323_v8 = vld [vmem:[%s1658_s7 + $0x8] sm:$0xff]  ;;  %vm333_vm1 = vcmask 261120   ;;  %s1330_s27 = sshll.u32 %s1570_s14, 7  ;;  %v1582_v59 = vmov 0  }
  0x33   : > { %1356 = vmatprep.subr.mxu0 %v325_v6  ;;  %1388 = vmatprep.subr.mxu1 %v325_v6  ;;  %v322_v9 = vld [vmem:[%s1658_s7] sm:$0xff]  ;;  %v307_v12 = vld [vmem:[%s2249_s0 + $0x8] sm:$0xff]  ;;  %v308_v14 = vld [vmem:[%s2249_s0 + $0x10] sm:$0xff]  ;;  %s1771_s4 = scalar_lea.vmem [#allocation4], %s1330_s27  ;;  %vm865_vm2 = vcmask 7168   ;;  %p1331_p11 = scmp.ne.s32.totalorder %s1570_s14, 2 }
  0x34   : > { %1357 = vmatpush3.msra.mxu0 %v325_v6  ;;  %1392 = vmatpush3.msra.mxu1 %v325_v6  ;;  %v306_v10 = vld [vmem:[%s2249_s0] sm:$0xff]  ;;  %v315_v13 = vld [vmem:[%s2249_s0 + $0x48] sm:$0xff]  ;;  %v316_v15 = vld [vmem:[%s2249_s0 + $0x50] sm:$0xff] }
  0x35   : > { %1358 = vmatprep.subr.mxu0 %v324_v7  ;;  %1389 = vmatprep.subr.mxu1 %v324_v7  ;;  %v314_v11 = vld [vmem:[%s2249_s0 + $0x40] sm:$0xff]  ;;  %v309_v16 = vld [vmem:[%s2249_s0 + $0x18] sm:$0xff]  ;;  %v311_v20 = vld [vmem:[%s2249_s0 + $0x28] sm:$0xff] }
  0x36   : > { %1359 = vmatpush3.msra.mxu0 %v324_v7  ;;  %1393 = vmatpush3.msra.mxu1 %v324_v7  ;;  %v317_v17 = vld [vmem:[%s2249_s0 + $0x58] sm:$0xff]  ;;  %v310_v18 = vld [vmem:[%s2249_s0 + $0x20] sm:$0xff]  ;;  %v319_v21 = vld [vmem:[%s2249_s0 + $0x68] sm:$0xff] }
  0x37   : > { %1360 = vmatprep.subr.mxu0 %v323_v8  ;;  %1390 = vmatprep.subr.mxu1 %v323_v8  ;;  %v318_v19 = vld [vmem:[%s2249_s0 + $0x60] sm:$0xff]  ;;  %v312_v22 = vld [vmem:[%s2249_s0 + $0x30] sm:$0xff]  ;;  %v313_v24 = vld [vmem:[%s2249_s0 + $0x38] sm:$0xff] }
  0x38   : > { %1361 = vmatpush3.msra.mxu0 %v323_v8  ;;  %1394 = vmatpush3.msra.mxu1 %v323_v8  ;;  %v320_v23 = vld [vmem:[%s2249_s0 + $0x70] sm:$0xff]  ;;  %v321_v25 = vld [vmem:[%s2249_s0 + $0x78] sm:$0xff]  ;;  %v1313_v26 = vld [vmem:[%s261_s6] ss:$0 sm:$0xff] }
  0x39   : > { %1362 = vmatprep.subr.mxu0 %v322_v9  ;;  %1391 = vmatprep.subr.mxu1 %v322_v9  ;;  %v1849_v60 = vld [vmem:[#allocation2 + $0x48] sm:$0xff]  ;;  %v1859_v2 = vld [vmem:[#allocation2 + $0x18] sm:$0xff]  ;;  %v1861_v3 = vld [vmem:[#allocation2] sm:$0xff] }
  0x3a   : > { %1363 = vmatpush3.msra.mxu0 %v322_v9  ;;  %1395 = vmatpush3.msra.mxu1 %v322_v9  ;;  %v1851_v61 = vld [vmem:[#allocation2 + $0x8] sm:$0xff] }
  0x3b   : > { %1364 = vmatprep.mubr.msk.f32.mxu0 %vm333_vm1, %v306_v10  ;;  %1376 = vmatprep.mubr.msk.f32.mxu1 %vm333_vm1, %v314_v11  ;;  %v1879_v10 = vld [vmem:[#allocation2 + $0x58] sm:$0xff]  ;;  %v1881_v11 = vld [vmem:[#allocation2 + $0x40] sm:$0xff] }
  0x3c   : > { %1365 = vmatmul.mubr.msk.f32.vlgmr.msra.gmra.mxu0 %vm333_vm1, %v307_v12  ;;  %1377 = vmatmul.mubr.msk.f32.vlgmr.msra.gmra.mxu1 %vm333_vm1, %v315_v13 }
  0x3d   : > { %1367 = vmatprep.mubr.msk.f32.mxu0 %vm333_vm1, %v308_v14  ;;  %1379 = vmatprep.mubr.msk.f32.mxu1 %vm333_vm1, %v316_v15 }
  0x3e   : > { %1441 = vset.pattern.permute.xlu0 %v1582_v59  ;;  %1440 = vset.pattern.permute.xlu1 %v1582_v59  ;;  %v1958_v59 = vld [vmem:[#allocation2 + $0x30] sm:$0xff] }
  0x40   : > { %1368 = vmatmul.mubr.msk.f32.gmra.mxu0 %vm333_vm1, %v309_v16  ;;  %1380 = vmatmul.mubr.msk.f32.gmra.mxu1 %vm333_vm1, %v317_v17 }
  0x41   : > { %1370 = vmatprep.mubr.msk.f32.mxu0 %vm333_vm1, %v310_v18  ;;  %1382 = vmatprep.mubr.msk.f32.mxu1 %vm333_vm1, %v318_v19  ;;  %v1898_v18 = vld [vmem:[#allocation2 + $0x10] sm:$0xff] }
  0x42   : > { %v1900_v19 = vld [vmem:[#allocation2 + $0x50] sm:$0xff] }
  0x44   : > { %1371 = vmatmul.mubr.msk.f32.gmra.mxu0 %vm333_vm1, %v311_v20  ;;  %1383 = vmatmul.mubr.msk.f32.gmra.mxu1 %vm333_vm1, %v319_v21 }
  0x45   : > { %1373 = vmatprep.mubr.msk.f32.mxu0 %vm333_vm1, %v312_v22  ;;  %1385 = vmatprep.mubr.msk.f32.mxu1 %vm333_vm1, %v320_v23 }
  0x48   : > { %1374 = vmatmul.mubr.msk.f32.gmra.mxu0 %vm333_vm1, %v313_v24  ;;  %1386 = vmatmul.mubr.msk.f32.gmra.mxu1 %vm333_vm1, %v321_v25 }
  0xfc   : > { %v1366_v27 = vpop.f32.mrf.mxu0  ;;  %v1378_v28 = vpop.f32.mrf.mxu1 }
  0xfd   : > { %v1767_v29 = vadd.f32 %v1366_v27, %v1313_v26  ;;  %v1769_v30 = vadd.f32 %v1378_v28, %v1313_v26  ;;  %v1920_v27 = vld [vmem:[#allocation2 + $0x20] sm:$0xff] }
  0xfe   : > { %v448_v31 = vpop.f32.mrf.mxu0  ;;  %v488_v32 = vpop.f32.mrf.mxu1 }
  0xff   : > { %530 = vst [vmem:[%s1771_s4 + $0x8] sm:$0xff] %v1767_v29  ;;  %538 = vst [vmem:[%s1771_s4 + $0x48] sm:$0xff] %v1769_v30  ;;  %v1777_v33 = vadd.f32 %v1313_v26, %v448_v31  ;;  %579 = vmax.xlane.f32.xlu1 %v1769_v30  ;;  %563 = vmax.xlane.f32.xlu0 %v1767_v29  ;;  %v1781_v34 = vadd.f32 %v1313_v26, %v488_v32 }
 0x100   : > { %v1369_v35 = vpop.f32.mrf.mxu0  ;;  %v1381_v36 = vpop.f32.mrf.mxu1 }
 0x101   : > { %529 = vst [vmem:[%s1771_s4] sm:$0xff] %v1777_v33  ;;  %v1785_v37 = vadd.f32 %v1369_v35, %v1313_v26  ;;  %537 = vst [vmem:[%s1771_s4 + $0x40] sm:$0xff] %v1781_v34  ;;  %v1789_v38 = vadd.f32 %v1381_v36, %v1313_v26 }
 0x102   : > { %v458_v39 = vpop.f32.mrf.mxu0  ;;  %v498_v40 = vpop.f32.mrf.mxu1 }
 0x103   : > { %532 = vst [vmem:[%s1771_s4 + $0x18] sm:$0xff] %v1785_v37  ;;  %567 = vmax.xlane.f32.xlu1 %v1785_v37  ;;  %561 = vmax.xlane.f32.xlu0 %v1777_v33  ;;  %v1795_v41 = vadd.f32 %v1313_v26, %v458_v39  ;;  %540 = vst [vmem:[%s1771_s4 + $0x58] sm:$0xff] %v1789_v38  ;;  %v1799_v42 = vadd.f32 %v1313_v26, %v498_v40  ;;  %v1937_v40 = vld [vmem:[#allocation2 + $0x68] sm:$0xff] }
 0x104   : > { %v1372_v43 = vpop.f32.mrf.mxu0  ;;  %v1384_v44 = vpop.f32.mrf.mxu1 }
 0x105   : > { %531 = vst [vmem:[%s1771_s4 + $0x10] sm:$0xff] %v1795_v41  ;;  %539 = vst [vmem:[%s1771_s4 + $0x50] sm:$0xff] %v1799_v42  ;;  %v1805_v45 = vadd.f32 %v1372_v43, %v1313_v26  ;;  %v1807_v46 = vadd.f32 %v1384_v44, %v1313_v26  ;;  %v1939_v43 = vld [vmem:[#allocation2 + $0x60] sm:$0xff] }
 0x106   : > { %v468_v47 = vpop.f32.mrf.mxu0  ;;  %v508_v48 = vpop.f32.mrf.mxu1 }
 0x107   : > { %583 = vmax.xlane.f32.xlu1 %v1789_v38  ;;  %577 = vmax.xlane.f32.xlu0 %v1781_v34  ;;  %534 = vst [vmem:[%s1771_s4 + $0x28] sm:$0xff] %v1805_v45  ;;  %542 = vst [vmem:[%s1771_s4 + $0x68] sm:$0xff] %v1807_v46  ;;  %v1815_v49 = vadd.f32 %v1313_v26, %v468_v47  ;;  %v1817_v50 = vadd.f32 %v1313_v26, %v508_v48 }
 0x108   : > { %v1375_v51 = vpop.f32.mrf.mxu0  ;;  %v1387_v52 = vpop.f32.mrf.mxu1 }
 0x109   : > { %533 = vst [vmem:[%s1771_s4 + $0x20] sm:$0xff] %v1815_v49  ;;  %v1821_v53 = vadd.f32 %v1375_v51, %v1313_v26  ;;  %541 = vst [vmem:[%s1771_s4 + $0x60] sm:$0xff] %v1817_v50  ;;  %v1825_v54 = vadd.f32 %v1387_v52, %v1313_v26 }
 0x10a   : > { %v478_v55 = vpop.f32.mrf.mxu0  ;;  %v518_v56 = vpop.f32.mrf.mxu1 }
 0x10b   : > { %565 = vmax.xlane.f32.xlu1 %v1795_v41  ;;  %581 = vmax.xlane.f32.xlu0 %v1799_v42  ;;  %536 = vst [vmem:[%s1771_s4 + $0x38] sm:$0xff] %v1821_v53  ;;  %544 = vst [vmem:[%s1771_s4 + $0x78] sm:$0xff] %v1825_v54  ;;  %v1833_v57 = vadd.f32 %v1313_v26, %v478_v55  ;;  %v1835_v58 = vadd.f32 %v1313_v26, %v518_v56  ;;  %v1918_v26 = vld [vmem:[#allocation2 + $0x28] sm:$0xff]  ;;  %v1956_v56 = vld [vmem:[#allocation2 + $0x38] sm:$0xff] }
 0x10d   : > { %535 = vst [vmem:[%s1771_s4 + $0x30] sm:$0xff] %v1833_v57  ;;  %543 = vst [vmem:[%s1771_s4 + $0x70] sm:$0xff] %v1835_v58 }
 0x10f   : > { %571 = vmax.xlane.f32.xlu1 %v1805_v45  ;;  %569 = vmax.xlane.f32.xlu0 %v1815_v49 }
 0x113   : > { %587 = vmax.xlane.f32.xlu1 %v1807_v46  ;;  %585 = vmax.xlane.f32.xlu0 %v1817_v50 }
 0x117   : > { %575 = vmax.xlane.f32.xlu1 %v1821_v53  ;;  %573 = vmax.xlane.f32.xlu0 %v1833_v57 }
 0x11b   : > { %591 = vmax.xlane.f32.xlu1 %v1825_v54  ;;  %589 = vmax.xlane.f32.xlu0 %v1835_v58 }
 0x188   : > { %v580_v62 = vpop.xlane.xlu1 %579  ;;  %v564_v63 = vpop.xlane.xlu0 %563 }
 0x189   : > { %v1854_v0 = vmax.f32 %v1849_v60, %v580_v62  ;;  %v1857_v1 = vmax.f32 %v1851_v61, %v564_v63 }
 0x18b   : > { %891 = vst.msk [vmem:[#allocation2 + $0x48] sm:$0xff] %vm865_vm2, %v1854_v0  ;;  %v626_v5 = vsub.f32 %v1851_v61, %v1857_v1  ;;  %883 = vst.msk [vmem:[#allocation2 + $0x8] sm:$0xff] %vm865_vm2, %v1857_v1  ;;  %696 = vperm.xlu1 %1440, %v1857_v1   ;;  %736 = vperm.xlu0 %1441, %v1854_v0  }
 0x18c   : > { %v568_v6 = vpop.xlane.xlu1 %567  ;;  %v562_v7 = vpop.xlane.xlu0 %561 }
 0x18d   : > { %v1874_v8 = vmax.f32 %v1859_v2, %v568_v6  ;;  %v1877_v9 = vmax.f32 %v1861_v3, %v562_v7 }
 0x18f   : > { %885 = vst.msk [vmem:[#allocation2 + $0x18] sm:$0xff] %vm865_vm2, %v1874_v8  ;;  %882 = vst.msk [vmem:[#allocation2] sm:$0xff] %vm865_vm2, %v1877_v9  ;;  %691 = vperm.xlu0 %1441, %v1877_v9  }
 0x190   : > { %v584_v14 = vpop.xlane.xlu1 %583  ;;  %v578_v15 = vpop.xlane.xlu0 %577 }
 0x191   : > { %v1893_v16 = vmax.f32 %v1879_v10, %v584_v14  ;;  %v1896_v17 = vmax.f32 %v1881_v11, %v578_v15 }
 0x193   : > { %893 = vst.msk [vmem:[#allocation2 + $0x58] sm:$0xff] %vm865_vm2, %v1893_v16  ;;  %890 = vst.msk [vmem:[#allocation2 + $0x40] sm:$0xff] %vm865_vm2, %v1896_v17  ;;  %746 = vperm.xlu0 %1441, %v1893_v16   ;;  %731 = vperm.xlu1 %1440, %v1896_v17  }
 0x194   : > { %v566_v22 = vpop.xlane.xlu1 %565  ;;  %v582_v23 = vpop.xlane.xlu0 %581 }
 0x195   : > { %v1913_v24 = vmax.f32 %v1898_v18, %v566_v22  ;;  %v1916_v25 = vmax.f32 %v1900_v19, %v582_v23  ;;  %v1976_v22 = vld [vmem:[#allocation2 + $0x78] sm:$0xff]  ;;  %v1978_v23 = vld [vmem:[#allocation2 + $0x70] sm:$0xff] }
 0x197   : > { %884 = vst.msk [vmem:[#allocation2 + $0x10] sm:$0xff] %vm865_vm2, %v1913_v24  ;;  %892 = vst.msk [vmem:[#allocation2 + $0x50] sm:$0xff] %vm865_vm2, %v1916_v25  ;;  %706 = vperm.xlu1 %1440, %v1874_v8   ;;  %v2258_v1 = vsub.f32 %v1898_v18, %v1913_v24 }
 0x198   : > { %v572_v32 = vpop.xlane.xlu1 %571  ;;  %v570_v35 = vpop.xlane.xlu0 %569 }
 0x199   : > { %v1932_v36 = vmax.f32 %v1918_v26, %v572_v32  ;;  %v1935_v39 = vmax.f32 %v1920_v27, %v570_v35 }
 0x19b   : > { %887 = vst.msk [vmem:[#allocation2 + $0x28] sm:$0xff] %vm865_vm2, %v1932_v36  ;;  %701 = vperm.xlu1 %1440, %v1913_v24   ;;  %886 = vst.msk [vmem:[#allocation2 + $0x20] sm:$0xff] %vm865_vm2, %v1935_v39  ;;  %v2260_v18 = vsub.f32 %v1918_v26, %v1932_v36 }
 0x19c   : > { %v588_v48 = vpop.xlane.xlu1 %587  ;;  %v586_v51 = vpop.xlane.xlu0 %585 }
 0x19d   : > { %v1951_v52 = vmax.f32 %v1937_v40, %v588_v48  ;;  %v1954_v55 = vmax.f32 %v1939_v43, %v586_v51  ;;  %v651_v24 = vmul.f32 1.442695, %v2260_v18  ;;  %v616_v18 = vld [vmem:[#allocation3 + $0x38] sm:$0xff] }
 0x19f   : > { %895 = vst.msk [vmem:[#allocation2 + $0x68] sm:$0xff] %vm865_vm2, %v1951_v52  ;;  %756 = vperm.xlu0 %1441, %v1951_v52   ;;  %741 = vperm.xlu1 %1440, %v1916_v25   ;;  %894 = vst.msk [vmem:[#allocation2 + $0x60] sm:$0xff] %vm865_vm2, %v1954_v55 }
 0x1a0   : > { %v576_v6 = vpop.xlane.xlu1 %575  ;;  %v574_v7 = vpop.xlane.xlu0 %573 }
 0x1a1   : > { %v1971_v14 = vmax.f32 %v1956_v56, %v576_v6  ;;  %v1974_v15 = vmax.f32 %v1958_v59, %v574_v7 }
 0x1a3   : > { %889 = vst.msk [vmem:[#allocation2 + $0x38] sm:$0xff] %vm865_vm2, %v1971_v14  ;;  %716 = vperm.xlu1 %1440, %v1932_v36   ;;  %888 = vst.msk [vmem:[#allocation2 + $0x30] sm:$0xff] %vm865_vm2, %v1974_v15 }
 0x1a4   : > { %v592_v48 = vpop.xlane.xlu1 %591  ;;  %v590_v51 = vpop.xlane.xlu0 %589 }
 0x1a5   : > { %v1990_v6 = vmax.f32 %v1976_v22, %v592_v48  ;;  %v1993_v7 = vmax.f32 %v1978_v23, %v590_v51 }
 0x1a7   : > { %897 = vst.msk [vmem:[#allocation2 + $0x78] sm:$0xff] %vm865_vm2, %v1990_v6  ;;  %766 = vperm.xlu0 %1441, %v1990_v6   ;;  %711 = vperm.xlu1 %1440, %v1935_v39   ;;  %896 = vst.msk [vmem:[#allocation2 + $0x70] sm:$0xff] %vm865_vm2, %v1993_v7 }
 0x1ab   : > { %751 = vperm.xlu1 %1440, %v1954_v55  }
 0x1af   : > { %726 = vperm.xlu1 %1440, %v1971_v14  }
 0x1b3   : > { %721 = vperm.xlu1 %1440, %v1974_v15  }
 0x1b7   : > { %761 = vperm.xlu1 %1440, %v1993_v7  }
 0x206   : > { %v697_v48 = vpop.permute.xlu1 %696  ;;  %v737_v51 = vpop.permute.xlu0 %736 }
 0x207   : > { %v770_v32 = vsub.f32 %v1767_v29, %v697_v48  ;;  %v778_v63 = vsub.f32 %v1769_v30, %v737_v51 }
 0x209   : > { %v787_v62 = vmul.f32 1.442695, %v770_v32  ;;  %v803_v47 = vmul.f32 1.442695, %v778_v63 }
 0x20a   : > { %v692_v35 = vpop.permute.xlu0 %691 }
 0x20b   : > { %1442 = vpow2.f32 %v787_v62  ;;  %v769_v44 = vsub.f32 %v1777_v33, %v692_v35 }
 0x20c   : > { %1444 = vpow2.f32 %v803_v47 }
 0x20d   : > { %v785_v31 = vmul.f32 1.442695, %v769_v44 }
 0x20e   : > { %v732_v28 = vpop.permute.xlu1 %731  ;;  %v747_v12 = vpop.permute.xlu0 %746 }
 0x20f   : > { %1446 = vpow2.f32 %v785_v31  ;;  %v777_v20 = vsub.f32 %v1781_v34, %v732_v28  ;;  %v780_v13 = vsub.f32 %v1789_v38, %v747_v12 }
 0x211   : > { %v801_v21 = vmul.f32 1.442695, %v777_v20  ;;  %v807_v63 = vmul.f32 1.442695, %v780_v13 }
 0x212   : > { %v707_v4 = vpop.permute.xlu1 %706 }
 0x213   : > { %1448 = vpow2.f32 %v801_v21  ;;  %v772_v29 = vsub.f32 %v1785_v37, %v707_v4 }
 0x215   : > { %v791_v30 = vmul.f32 1.442695, %v772_v29 }
 0x216   : > { %v702_v32 = vpop.permute.xlu1 %701 }
 0x217   : > { %1450 = vpow2.f32 %v791_v30  ;;  %v771_v33 = vsub.f32 %v1795_v41, %v702_v32 }
 0x218   : > { %v1443_v47 = vpop.eup %1442  ;;  %1452 = vpow2.f32 %v807_v63 }
 0x219   : > { %v1445_v44 = vpop.eup %1444  ;;  %v789_v62 = vmul.f32 1.442695, %v771_v33  ;;  %819 = vadd.xlane.f32.xlu0 %v1443_v47 }
 0x21a   : > { %835 = vadd.xlane.f32.xlu1 %v1445_v44  ;;  %v742_v34 = vpop.permute.xlu1 %741  ;;  %v757_v12 = vpop.permute.xlu0 %756 }
 0x21b   : > { %1454 = vpow2.f32 %v789_v62  ;;  %v779_v38 = vsub.f32 %v1799_v42, %v742_v34  ;;  %v782_v37 = vsub.f32 %v1807_v46, %v757_v12 }
 0x21c   : > { %v1447_v20 = vpop.eup %1446 }
 0x21d   : > { %v805_v21 = vmul.f32 1.442695, %v779_v38  ;;  %v811_v31 = vmul.f32 1.442695, %v782_v37 }
 0x21e   : > { %817 = vadd.xlane.f32.xlu1 %v1447_v20  ;;  %v717_v4 = vpop.permute.xlu1 %716 }
 0x21f   : > { %1456 = vpow2.f32 %v805_v21  ;;  %v774_v41 = vsub.f32 %v1805_v45, %v717_v4 }
 0x220   : > { %v1449_v13 = vpop.eup %1448 }
 0x221   : > { %v795_v28 = vmul.f32 1.442695, %v774_v41  ;;  %833 = vadd.xlane.f32.xlu0 %v1449_v13 }
 0x222   : > { %v712_v35 = vpop.permute.xlu1 %711  ;;  %v767_v46 = vpop.permute.xlu0 %766 }
 0x223   : > { %1458 = vpow2.f32 %v795_v28  ;;  %v773_v48 = vsub.f32 %v1815_v49, %v712_v35  ;;  %v784_v33 = vsub.f32 %v1825_v54, %v767_v46  ;;  %v643_v35 = vmul.f32 1.442695, %v626_v5 }
 0x224   : > { %v1451_v51 = vpop.eup %1450  ;;  %1460 = vpow2.f32 %v811_v31  ;;  %v2256_v46 = vsub.f32 %v1859_v2, %v1874_v8  ;;  %v2259_v2 = vsub.f32 %v1900_v19, %v1916_v25  ;;  %v617_v25 = vld [vmem:[#allocation3 + $0x40] sm:$0xff] }
 0x225   : > { %v793_v42 = vmul.f32 1.442695, %v773_v48  ;;  %823 = vadd.xlane.f32.xlu1 %v1451_v51  ;;  %v1453_v30 = vpop.eup %1452  ;;  %v815_v34 = vmul.f32 1.442695, %v784_v33  ;;  %v2254_v51 = vsub.f32 %v1861_v3, %v1877_v9  ;;  %v645_v3 = vmul.f32 1.442695, %v2258_v1 }
 0x226   : > { %v752_v29 = vpop.permute.xlu1 %751  ;;  %v647_v61 = vmul.f32 1.442695, %v2256_v46  ;;  %v610_v9 = vld [vmem:[#allocation3 + $0x8] sm:$0xff]  ;;  %v661_v8 = vmul.f32 1.442695, %v2259_v2 }
 0x227   : > { %1462 = vpow2.f32 %v793_v42  ;;  %v781_v63 = vsub.f32 %v1817_v50, %v752_v29  ;;  %v641_v42 = vmul.f32 1.442695, %v2254_v51  ;;  %v2255_v29 = vsub.f32 %v1881_v11, %v1896_v17  ;;  %v618_v11 = vld [vmem:[#allocation3 + $0x48] sm:$0xff]  ;;  %v619_v51 = vld [vmem:[#allocation3 + $0x50] sm:$0xff] }
 0x228   : > { %v1455_v32 = vpop.eup %1454  ;;  %v614_v1 = vld [vmem:[#allocation3 + $0x28] sm:$0xff] }
 0x229   : > { %v809_v45 = vmul.f32 1.442695, %v781_v63  ;;  %821 = vadd.xlane.f32.xlu0 %v1455_v32  ;;  %839 = vadd.xlane.f32.xlu1 %v1453_v30  ;;  %v657_v30 = vmul.f32 1.442695, %v2255_v29 }
 0x22a   : > { %v727_v47 = vpop.permute.xlu1 %726 }
 0x22b   : > { %1464 = vpow2.f32 %v809_v45  ;;  %v776_v49 = vsub.f32 %v1821_v53, %v727_v47  ;;  %v609_v47 = vld [vmem:[#allocation3] sm:$0xff] }
 0x22c   : > { %v1457_v44 = vpop.eup %1456 }
 0x22d   : > { %v799_v62 = vmul.f32 1.442695, %v776_v49  ;;  %837 = vadd.xlane.f32.xlu0 %v1457_v44 }
 0x22e   : > { %v722_v38 = vpop.permute.xlu1 %721 }
 0x22f   : > { %1466 = vpow2.f32 %v799_v62  ;;  %v775_v12 = vsub.f32 %v1833_v57, %v722_v38 }
 0x230   : > { %v1459_v20 = vpop.eup %1458  ;;  %1468 = vpow2.f32 %v815_v34  ;;  %v2261_v34 = vsub.f32 %v1920_v27, %v1935_v39  ;;  %v2263_v27 = vsub.f32 %v1939_v43, %v1954_v55 }
 0x231   : > { %v797_v50 = vmul.f32 1.442695, %v775_v12  ;;  %827 = vadd.xlane.f32.xlu1 %v1459_v20  ;;  %v1461_v37 = vpop.eup %1460  ;;  %v2262_v20 = vsub.f32 %v1937_v40, %v1951_v52  ;;  %v620_v52 = vld [vmem:[#allocation3 + $0x58] sm:$0xff] }
 0x232   : > { %v762_v21 = vpop.permute.xlu1 %761  ;;  %v649_v38 = vmul.f32 1.442695, %v2261_v34  ;;  %v665_v39 = vmul.f32 1.442695, %v2263_v27  ;;  %v624_v34 = vld [vmem:[#allocation3 + $0x78] sm:$0xff] }
 0x233   : > { %1470 = vpow2.f32 %v797_v50  ;;  %v783_v54 = vsub.f32 %v1835_v58, %v762_v21  ;;  %v2253_v58 = vsub.f32 %v1849_v60, %v1854_v0  ;;  %v2257_v60 = vsub.f32 %v1879_v10, %v1893_v16 }
 0x234   : > { %v1463_v4 = vpop.eup %1462  ;;  %v667_v50 = vmul.f32 1.442695, %v2262_v20 }
 0x235   : > { %v813_v41 = vmul.f32 1.442695, %v783_v54  ;;  %825 = vadd.xlane.f32.xlu0 %v1463_v4  ;;  %843 = vadd.xlane.f32.xlu1 %v1461_v37  ;;  %v659_v48 = vmul.f32 1.442695, %v2253_v58  ;;  %v663_v0 = vmul.f32 1.442695, %v2257_v60 }
 0x236   : > { %v612_v37 = vld [vmem:[#allocation3 + $0x18] sm:$0xff] }
 0x237   : > { %1472 = vpow2.f32 %v813_v41 }
 0x238   : > { %v1465_v53 = vpop.eup %1464  ;;  %1474 = vpow2.f32 %v643_v35 }
 0x239   : > { %841 = vadd.xlane.f32.xlu0 %v1465_v53  ;;  %1476 = vpow2.f32 %v659_v48 }
 0x23a   : > { %1478 = vpow2.f32 %v641_v42 }
 0x23b   : > { %1480 = vpow2.f32 %v657_v30  ;;  %v2265_v30 = vsub.f32 %v1958_v59, %v1974_v15  ;;  %v2267_v59 = vsub.f32 %v1978_v23, %v1993_v7 }
 0x23c   : > { %v1467_v13 = vpop.eup %1466  ;;  %1482 = vpow2.f32 %v647_v61 }
 0x23d   : > { %831 = vadd.xlane.f32.xlu1 %v1467_v13  ;;  %v1469_v28 = vpop.eup %1468  ;;  %1484 = vpow2.f32 %v663_v0  ;;  %v611_v13 = vld [vmem:[#allocation3 + $0x10] sm:$0xff]  ;;  %v653_v46 = vmul.f32 1.442695, %v2265_v30  ;;  %v669_v15 = vmul.f32 1.442695, %v2267_v59 }
 0x23e   : > { %1486 = vpow2.f32 %v645_v3 }
 0x23f   : > { %1488 = vpow2.f32 %v661_v8 }
 0x240   : > { %v1471_v57 = vpop.eup %1470  ;;  %1490 = vpow2.f32 %v651_v24 }
 0x241   : > { %829 = vadd.xlane.f32.xlu0 %v1471_v57  ;;  %847 = vadd.xlane.f32.xlu1 %v1469_v28  ;;  %1492 = vpow2.f32 %v649_v38  ;;  %v2264_v57 = vsub.f32 %v1956_v56, %v1971_v14  ;;  %v2266_v56 = vsub.f32 %v1976_v22, %v1990_v6  ;;  %v615_v38 = vld [vmem:[#allocation3 + $0x30] sm:$0xff] }
 0x242   : > { %1494 = vpow2.f32 %v667_v50 }
 0x243   : > { %1496 = vpow2.f32 %v665_v39  ;;  %v671_v14 = vmul.f32 1.442695, %v2266_v56 }
 0x244   : > { %v1473_v31 = vpop.eup %1472 }
 0x245   : > { %845 = vadd.xlane.f32.xlu0 %v1473_v31  ;;  %v1475_v5 = vpop.eup %1474  ;;  %v655_v31 = vmul.f32 1.442695, %v2264_v57 }
 0x246   : > { %v1477_v63 = vpop.eup %1476  ;;  %v674_v17 = vmul.f32 %v1475_v5, %v610_v9 }
 0x247   : > { %v682_v32 = vmul.f32 %v1477_v63, %v618_v11  ;;  %v1479_v10 = vpop.eup %1478  ;;  %1498 = vpow2.f32 %v655_v31  ;;  %v622_v63 = vld [vmem:[#allocation3 + $0x68] sm:$0xff]  ;;  %v613_v11 = vld [vmem:[#allocation3 + $0x20] sm:$0xff] }
 0x248   : > { %v1481_v44 = vpop.eup %1480  ;;  %v673_v19 = vmul.f32 %v1479_v10, %v609_v47  ;;  %1500 = vpow2.f32 %v653_v46 }
 0x249   : > { %v681_v26 = vmul.f32 %v1481_v44, %v617_v25  ;;  %v1483_v36 = vpop.eup %1482  ;;  %1502 = vpow2.f32 %v671_v14 }
 0x24a   : > { %v1485_v4 = vpop.eup %1484  ;;  %v676_v41 = vmul.f32 %v1483_v36, %v612_v37  ;;  %1504 = vpow2.f32 %v669_v15  ;;  %v623_v37 = vld [vmem:[#allocation3 + $0x70] sm:$0xff] }
 0x24b   : > { %v1487_v53 = vpop.eup %1486  ;;  %v684_v35 = vmul.f32 %v1485_v4, %v620_v52 }
 0x24c   : > { %v675_v58 = vmul.f32 %v1487_v53, %v611_v13  ;;  %v1489_v48 = vpop.eup %1488 }
 0x24d   : > { %v683_v61 = vmul.f32 %v1489_v48, %v619_v51  ;;  %v1491_v60 = vpop.eup %1490 }
 0x24e   : > { %v1493_v5 = vpop.eup %1492  ;;  %v678_v22 = vmul.f32 %v1491_v60, %v614_v1 }
 0x24f   : > { %v1495_v6 = vpop.eup %1494 }
 0x250   : > { %v686_v8 = vmul.f32 %v1495_v6, %v622_v63 }
 0x2a2   : > { %v820_v45 = vpop.xlane.xlu0 %819 }
 0x2a3   : > { %v836_v16 = vpop.xlane.xlu1 %835  ;;  %v850_v33 = vadd.f32 %v820_v45, %v674_v17  ;;  %v677_v17 = vmul.f32 %v1493_v5, %v613_v11 }
 0x2a4   : > { %v858_v49 = vadd.f32 %v836_v16, %v682_v32  ;;  %v1497_v32 = vpop.eup %1496  ;;  %v621_v16 = vld [vmem:[#allocation3 + $0x60] sm:$0xff] }
 0x2a5   : > { %867 = vst.msk [vmem:[#allocation3 + $0x8] sm:$0xff] %vm865_vm2, %v850_v33  ;;  %v685_v7 = vmul.f32 %v1497_v32, %v621_v16  ;;  %v1499_v47 = vpop.eup %1498 }
 0x2a6   : > { %875 = vst.msk [vmem:[#allocation3 + $0x48] sm:$0xff] %vm865_vm2, %v858_v49  ;;  %v1501_v44 = vpop.eup %1500 }
 0x2a7   : > { %v818_v62 = vpop.xlane.xlu1 %817  ;;  %v1503_v25 = vpop.eup %1502  ;;  %v679_v50 = vmul.f32 %v1501_v44, %v615_v38 }
 0x2a8   : > { %v849_v12 = vadd.f32 %v818_v62, %v673_v19  ;;  %v680_v19 = vmul.f32 %v1499_v47, %v616_v18  ;;  %v688_v20 = vmul.f32 %v1503_v25, %v624_v34 }
 0x2aa   : > { %866 = vst.msk [vmem:[#allocation3] sm:$0xff] %vm865_vm2, %v849_v12  ;;  %v834_v21 = vpop.xlane.xlu0 %833 }
 0x2ab   : > { %v857_v54 = vadd.f32 %v834_v21, %v681_v26  ;;  %v1505_v26 = vpop.eup %1504 }
 0x2ac   : > { %v687_v27 = vmul.f32 %v1505_v26, %v623_v37 }
 0x2ad   : > { %874 = vst.msk [vmem:[#allocation3 + $0x40] sm:$0xff] %vm865_vm2, %v857_v54 }
 0x2ae   : > { %v824_v40 = vpop.xlane.xlu1 %823 }
 0x2af   : > { %v852_v28 = vadd.f32 %v824_v40, %v676_v41 }
 0x2b1   : > { %869 = vst.msk [vmem:[#allocation3 + $0x18] sm:$0xff] %vm865_vm2, %v852_v28 }
 0x2b2   : > { %v840_v43 = vpop.xlane.xlu1 %839  ;;  %v822_v55 = vpop.xlane.xlu0 %821 }
 0x2b3   : > { %v860_v42 = vadd.f32 %v840_v43, %v684_v35  ;;  %v851_v29 = vadd.f32 %v822_v55, %v675_v58 }
 0x2b5   : > { %877 = vst.msk [vmem:[#allocation3 + $0x58] sm:$0xff] %vm865_vm2, %v860_v42  ;;  %868 = vst.msk [vmem:[#allocation3 + $0x10] sm:$0xff] %vm865_vm2, %v851_v29 }
 0x2b6   : > { %v838_v0 = vpop.xlane.xlu0 %837 }
 0x2b7   : > { %v859_v3 = vadd.f32 %v838_v0, %v683_v61 }
 0x2b9   : > { %876 = vst.msk [vmem:[#allocation3 + $0x50] sm:$0xff] %vm865_vm2, %v859_v3 }
 0x2ba   : > { %v828_v9 = vpop.xlane.xlu1 %827 }
 0x2bb   : > { %v854_v2 = vadd.f32 %v828_v9, %v678_v22 }
 0x2bd   : > { %871 = vst.msk [vmem:[#allocation3 + $0x28] sm:$0xff] %vm865_vm2, %v854_v2 }
 0x2be   : > { %v844_v45 = vpop.xlane.xlu1 %843  ;;  %v826_v10 = vpop.xlane.xlu0 %825 }
 0x2bf   : > { %v862_v33 = vadd.f32 %v844_v45, %v686_v8  ;;  %v853_v23 = vadd.f32 %v826_v10, %v677_v17 }
 0x2c1   : > { %879 = vst.msk [vmem:[#allocation3 + $0x68] sm:$0xff] %vm865_vm2, %v862_v33  ;;  %870 = vst.msk [vmem:[#allocation3 + $0x20] sm:$0xff] %vm865_vm2, %v853_v23 }
 0x2c2   : > { %v842_v49 = vpop.xlane.xlu0 %841 }
 0x2c3   : > { %v861_v24 = vadd.f32 %v842_v49, %v685_v7 }
 0x2c5   : > { %878 = vst.msk [vmem:[#allocation3 + $0x60] sm:$0xff] %vm865_vm2, %v861_v24 }
 0x2c6   : > { %v832_v62 = vpop.xlane.xlu1 %831 }
 0x2c7   : > { %v856_v12 = vadd.f32 %v832_v62, %v680_v19 }
 0x2c9   : > { %873 = vst.msk [vmem:[#allocation3 + $0x38] sm:$0xff] %vm865_vm2, %v856_v12 }
 0x2ca   : > { %v848_v36 = vpop.xlane.xlu1 %847  ;;  %v830_v21 = vpop.xlane.xlu0 %829 }
 0x2cb   : > { %v864_v54 = vadd.f32 %v848_v36, %v688_v20  ;;  %v855_v4 = vadd.f32 %v830_v21, %v679_v50 }
 0x2cd   : > { %881 = vst.msk [vmem:[#allocation3 + $0x78] sm:$0xff] %vm865_vm2, %v864_v54  ;;  %872 = vst.msk [vmem:[#allocation3 + $0x30] sm:$0xff] %vm865_vm2, %v855_v4  ;;  %901 = sbr.rel (%p1331_p11) target bundleno = 898 (0x382), region = 78 }
 0x2ce   : > { %v846_v39 = vpop.xlane.xlu0 %845 }
 0x2cf   : > { %v863_v41 = vadd.f32 %v846_v39, %v687_v27 }
 0x2d1   : > { %880 = vst.msk [vmem:[#allocation3 + $0x70] sm:$0xff] %vm865_vm2, %v863_v41 }
 0x2d2   : > { %v920_v53 = vld [vmem:[#allocation3 + $0x10] sm:$0xff]  ;;  %v1583_v40 = vmov 0   ;;  %v918_v52 = vld [vmem:[#allocation3] sm:$0xff]  ;;  %v921_v13 = vld [vmem:[#allocation3 + $0x18] sm:$0xff] }
 0x2d3   : > { %1507 = vset.pattern.permute.xlu1 %v1583_v40  ;;  %1506 = vset.pattern.permute.xlu0 %v1583_v40  ;;  %1508 = vlog2.f32 %v920_v53  ;;  %v919_v28 = vld [vmem:[#allocation3 + $0x8] sm:$0xff]  ;;  %v922_v31 = vld [vmem:[#allocation3 + $0x20] sm:$0xff]  ;;  %v925_v35 = vld [vmem:[#allocation3 + $0x38] sm:$0xff] }
 0x2d4   : > { %1510 = vlog2.f32 %v918_v52  ;;  %v923_v57 = vld [vmem:[#allocation3 + $0x28] sm:$0xff]  ;;  %v924_v58 = vld [vmem:[#allocation3 + $0x30] sm:$0xff]  ;;  %v926_v43 = vld [vmem:[#allocation3 + $0x40] sm:$0xff] }
 0x2d5   : > { %1512 = vlog2.f32 %v921_v13  ;;  %v927_v48 = vld [vmem:[#allocation3 + $0x48] sm:$0xff]  ;;  %v929_v55 = vld [vmem:[#allocation3 + $0x58] sm:$0xff]  ;;  %v928_v51 = vld [vmem:[#allocation3 + $0x50] sm:$0xff] }
 0x2d6   : > { %1514 = vlog2.f32 %v919_v28  ;;  %v904_v29 = vld [vmem:[#allocation2 + $0x10] sm:$0xff]  ;;  %v902_v56 = vld [vmem:[#allocation2] sm:$0xff]  ;;  %v905_v60 = vld [vmem:[#allocation2 + $0x18] sm:$0xff] }
 0x2d7   : > { %1516 = vlog2.f32 %v923_v57  ;;  %v931_v0 = vld [vmem:[#allocation3 + $0x68] sm:$0xff]  ;;  %v930_v15 = vld [vmem:[#allocation3 + $0x60] sm:$0xff]  ;;  %v933_v10 = vld [vmem:[#allocation3 + $0x78] sm:$0xff] }
 0x2d8   : > { %1518 = vlog2.f32 %v922_v31  ;;  %v903_v59 = vld [vmem:[#allocation2 + $0x8] sm:$0xff]  ;;  %v906_v33 = vld [vmem:[#allocation2 + $0x20] sm:$0xff]  ;;  %v932_v23 = vld [vmem:[#allocation3 + $0x70] sm:$0xff] }
 0x2d9   : > { %1520 = vlog2.f32 %v925_v35  ;;  %v907_v32 = vld [vmem:[#allocation2 + $0x28] sm:$0xff]  ;;  %v909_v24 = vld [vmem:[#allocation2 + $0x38] sm:$0xff]  ;;  %v908_v25 = vld [vmem:[#allocation2 + $0x30] sm:$0xff] }
 0x2da   : > { %1522 = vlog2.f32 %v924_v58  ;;  %v911_v20 = vld [vmem:[#allocation2 + $0x48] sm:$0xff]  ;;  %v910_v36 = vld [vmem:[#allocation2 + $0x40] sm:$0xff]  ;;  %v913_v27 = vld [vmem:[#allocation2 + $0x58] sm:$0xff] }
 0x2db   : > { %1524 = vlog2.f32 %v927_v48  ;;  %v912_v53 = vld [vmem:[#allocation2 + $0x50] sm:$0xff]  ;;  %v915_v57 = vld [vmem:[#allocation2 + $0x68] sm:$0xff]  ;;  %v914_v58 = vld [vmem:[#allocation2 + $0x60] sm:$0xff] }
 0x2dc   : > { %1526 = vlog2.f32 %v926_v43 }
 0x2dd   : > { %1528 = vlog2.f32 %v929_v55 }
 0x2de   : > { %1530 = vlog2.f32 %v928_v51  ;;  %v917_v51 = vld [vmem:[#allocation2 + $0x78] sm:$0xff] }
 0x2df   : > { %1532 = vlog2.f32 %v931_v0  ;;  %v1111_v0 = vld [vmem:[#allocation4 + $0x80] sm:$0xff] }
 0x2e0   : > { %v1509_v42 = vpop.eup %1508  ;;  %1534 = vlog2.f32 %v930_v15 }
 0x2e1   : > { %v1511_v30 = vpop.eup %1510  ;;  %v939_v46 = vmul.f32 0.6931472, %v1509_v42  ;;  %1536 = vlog2.f32 %v933_v10 }
 0x2e2   : > { %v1513_v14 = vpop.eup %1512  ;;  %v935_v61 = vmul.f32 0.6931472, %v1511_v30  ;;  %1538 = vlog2.f32 %v932_v23 }
 0x2e3   : > { %v1515_v1 = vpop.eup %1514  ;;  %v968_v3 = vadd.f32 %v939_v46, %v904_v29  ;;  %v941_v5 = vmul.f32 0.6931472, %v1513_v14  ;;  %v916_v29 = vld [vmem:[#allocation2 + $0x70] sm:$0xff] }
 0x2e4   : > { %v1517_v22 = vpop.eup %1516  ;;  %v966_v6 = vadd.f32 %v935_v61, %v902_v56  ;;  %v937_v9 = vmul.f32 0.6931472, %v1515_v1  ;;  %v984_v56 = vld [vmem:[#allocation4 + $0x10] sm:$0xff]  ;;  %v1160_v1 = vld [vmem:[#allocation4 + $0x100] sm:$0xff] }
 0x2e5   : > { %v1519_v63 = vpop.eup %1518  ;;  %1010 = vperm.xlu1 %1507, %v968_v3   ;;  %v969_v11 = vadd.f32 %v941_v5, %v905_v60  ;;  %v945_v2 = vmul.f32 0.6931472, %v1517_v22  ;;  %v1113_v14 = vld [vmem:[#allocation4 + $0x90] sm:$0xff]  ;;  %v982_v60 = vld [vmem:[#allocation4] sm:$0xff] }
 0x2e6   : > { %v1521_v8 = vpop.eup %1520  ;;  %1000 = vperm.xlu0 %1506, %v966_v6   ;;  %v967_v17 = vadd.f32 %v937_v9, %v903_v59  ;;  %v943_v45 = vmul.f32 0.6931472, %v1519_v63  ;;  %v1162_v61 = vld [vmem:[#allocation4 + $0x110] sm:$0xff] }
 0x2e7   : > { %v1523_v16 = vpop.eup %1522  ;;  %v971_v7 = vadd.f32 %v945_v2, %v907_v32  ;;  %v949_v47 = vmul.f32 0.6931472, %v1521_v8  ;;  %v1114_v2 = vld [vmem:[#allocation4 + $0x98] sm:$0xff]  ;;  %v1112_v32 = vld [vmem:[#allocation4 + $0x88] sm:$0xff] }
 0x2e8   : > { %v1525_v49 = vpop.eup %1524  ;;  %v970_v18 = vadd.f32 %v943_v45, %v906_v33  ;;  %v947_v44 = vmul.f32 0.6931472, %v1523_v16  ;;  %v1163_v8 = vld [vmem:[#allocation4 + $0x118] sm:$0xff]  ;;  %v1161_v45 = vld [vmem:[#allocation4 + $0x108] sm:$0xff] }
 0x2e9   : > { %1015 = vperm.xlu1 %1507, %v969_v11   ;;  %v1527_v19 = vpop.eup %1526  ;;  %v973_v62 = vadd.f32 %v949_v47, %v909_v24  ;;  %v953_v34 = vmul.f32 0.6931472, %v1525_v49  ;;  %v985_v11 = vld [vmem:[#allocation4 + $0x18] sm:$0xff]  ;;  %v987_v24 = vld [vmem:[#allocation4 + $0x28] sm:$0xff] }
 0x2ea   : > { %1005 = vperm.xlu0 %1506, %v967_v17   ;;  %v1529_v38 = vpop.eup %1528  ;;  %v972_v12 = vadd.f32 %v947_v44, %v908_v25  ;;  %v951_v50 = vmul.f32 0.6931472, %v1527_v19  ;;  %v983_v17 = vld [vmem:[#allocation4 + $0x8] sm:$0xff]  ;;  %v986_v25 = vld [vmem:[#allocation4 + $0x20] sm:$0xff] }
 0x2eb   : > { %v1531_v26 = vpop.eup %1530  ;;  %v975_v21 = vadd.f32 %v953_v34, %v911_v20  ;;  %v957_v37 = vmul.f32 0.6931472, %v1529_v38  ;;  %v1116_v44 = vld [vmem:[#allocation4 + $0xa8] sm:$0xff]  ;;  %v1164_v34 = vld [vmem:[#allocation4 + $0x120] sm:$0xff] }
 0x2ec   : > { %v1533_v54 = vpop.eup %1532  ;;  %v974_v4 = vadd.f32 %v951_v50, %v910_v36  ;;  %v955_v39 = vmul.f32 0.6931472, %v1531_v26  ;;  %v1165_v19 = vld [vmem:[#allocation4 + $0x128] sm:$0xff] }
 0x2ed   : > { %1025 = vperm.xlu1 %1507, %v971_v7   ;;  %v1535_v41 = vpop.eup %1534  ;;  %v977_v40 = vadd.f32 %v957_v37, %v913_v27  ;;  %v961_v52 = vmul.f32 0.6931472, %v1533_v54  ;;  %v989_v54 = vld [vmem:[#allocation4 + $0x38] sm:$0xff] }
 0x2ee   : > { %1020 = vperm.xlu0 %1506, %v970_v18   ;;  %v1537_v13 = vpop.eup %1536  ;;  %v976_v28 = vadd.f32 %v955_v39, %v912_v53  ;;  %v959_v31 = vmul.f32 0.6931472, %v1535_v41  ;;  %v1167_v27 = vld [vmem:[#allocation4 + $0x138] sm:$0xff]  ;;  %v988_v39 = vld [vmem:[#allocation4 + $0x30] sm:$0xff] }
 0x2ef   : > { %v1539_v35 = vpop.eup %1538  ;;  %v979_v48 = vadd.f32 %v961_v52, %v915_v57  ;;  %v965_v43 = vmul.f32 0.6931472, %v1537_v13  ;;  %v1117_v41 = vld [vmem:[#allocation4 + $0xb0] sm:$0xff] }
 0x2f0   : > { %v978_v55 = vadd.f32 %v959_v31, %v914_v58  ;;  %v963_v42 = vmul.f32 0.6931472, %v1539_v35  ;;  %v1166_v53 = vld [vmem:[#allocation4 + $0x130] sm:$0xff] }
 0x2f1   : > { %1035 = vperm.xlu1 %1507, %v973_v62   ;;  %v981_v30 = vadd.f32 %v965_v43, %v917_v51  ;;  %v1115_v62 = vld [vmem:[#allocation4 + $0xa0] sm:$0xff]  ;;  %v1120_v43 = vld [vmem:[#allocation4 + $0xc8] sm:$0xff] }
 0x2f2   : > { %1030 = vperm.xlu0 %1506, %v972_v12   ;;  %v980_v46 = vadd.f32 %v963_v42, %v916_v29  ;;  %v990_v51 = vld [vmem:[#allocation4 + $0x40] sm:$0xff] }
 0x2f3   : > { %v1119_v42 = vld [vmem:[#allocation4 + $0xc0] sm:$0xff] }
 0x2f4   : > { %v1168_v29 = vld [vmem:[#allocation4 + $0x140] sm:$0xff] }
 0x2f5   : > { %1045 = vperm.xlu1 %1507, %v975_v21  }
 0x2f6   : > { %1040 = vperm.xlu0 %1506, %v974_v4   ;;  %v1118_v4 = vld [vmem:[#allocation4 + $0xb8] sm:$0xff] }
 0x2f9   : > { %1055 = vperm.xlu1 %1507, %v977_v40  }
 0x2fa   : > { %1050 = vperm.xlu0 %1506, %v976_v28  }
 0x2fd   : > { %1065 = vperm.xlu1 %1507, %v979_v48   ;;  %v991_v48 = vld [vmem:[#allocation4 + $0x48] sm:$0xff] }
 0x2fe   : > { %1060 = vperm.xlu0 %1506, %v978_v55   ;;  %v1169_v55 = vld [vmem:[#allocation4 + $0x148] sm:$0xff] }
 0x301   : > { %1075 = vperm.xlu1 %1507, %v981_v30  }
 0x302   : > { %1070 = vperm.xlu0 %1506, %v980_v46  }
 0x360   : > { %v1011_v3 = vpop.permute.xlu1 %1010 }
 0x361   : > { %v1080_v5 = vsub.f32 %v984_v56, %v1011_v3  ;;  %v1129_v59 = vsub.f32 %v1113_v14, %v1011_v3  ;;  %v1178_v15 = vsub.f32 %v1162_v61, %v1011_v3  ;;  %v1001_v22 = vpop.permute.xlu0 %1000  ;;  %v993_v3 = vld [vmem:[#allocation4 + $0x58] sm:$0xff] }
 0x362   : > { %v1078_v6 = vsub.f32 %v982_v60, %v1001_v22  ;;  %v1127_v9 = vsub.f32 %v1111_v0, %v1001_v22  ;;  %v1176_v63 = vsub.f32 %v1160_v1, %v1001_v22  ;;  %v1121_v22 = vld [vmem:[#allocation4 + $0xd0] sm:$0xff] }
 0x363   : > { %1096 = vst [vmem:[%s2252_s3 + $0x30] sm:$0xff] %v1080_v5  ;;  %1145 = vst [vmem:[%s2252_s3 + $0x38] sm:$0xff] %v1129_v59  ;;  %v1122_v5 = vld [vmem:[#allocation4 + $0xd8] sm:$0xff] }
 0x364   : > { %1194 = vst [vmem:[%s2252_s3 + $0x40] sm:$0xff] %v1178_v15  ;;  %1094 = vst [vmem:[%s2252_s3] sm:$0xff] %v1078_v6  ;;  %v1016_v10 = vpop.permute.xlu1 %1015  ;;  %v1171_v59 = vld [vmem:[#allocation4 + $0x158] sm:$0xff]  ;;  %v992_v15 = vld [vmem:[#allocation4 + $0x50] sm:$0xff] }
 0x365   : > { %1143 = vst [vmem:[%s2252_s3 + $0x8] sm:$0xff] %v1127_v9  ;;  %1192 = vst [vmem:[%s2252_s3 + $0x10] sm:$0xff] %v1176_v63  ;;  %v1081_v16 = vsub.f32 %v985_v11, %v1016_v10  ;;  %v1130_v33 = vsub.f32 %v1114_v2, %v1016_v10  ;;  %v1179_v23 = vsub.f32 %v1163_v8, %v1016_v10  ;;  %v1006_v7 = vpop.permute.xlu0 %1005  ;;  %v1170_v6 = vld [vmem:[#allocation4 + $0x150] sm:$0xff]  ;;  %v995_v10 = vld [vmem:[#allocation4 + $0x68] sm:$0xff] }
 0x366   : > { %v1079_v47 = vsub.f32 %v983_v17, %v1006_v7  ;;  %v1128_v49 = vsub.f32 %v1112_v32, %v1006_v7  ;;  %v1177_v18 = vsub.f32 %v1161_v45, %v1006_v7  ;;  %v1123_v7 = vld [vmem:[#allocation4 + $0xe0] sm:$0xff] }
 0x367   : > { %1097 = vst [vmem:[%s2252_s3 + $0x48] sm:$0xff] %v1081_v16  ;;  %1146 = vst [vmem:[%s2252_s3 + $0x50] sm:$0xff] %v1130_v33  ;;  %v1124_v16 = vld [vmem:[#allocation4 + $0xe8] sm:$0xff] }
 0x368   : > { %1195 = vst [vmem:[%s2252_s3 + $0x58] sm:$0xff] %v1179_v23  ;;  %1095 = vst [vmem:[%s2252_s3 + $0x18] sm:$0xff] %v1079_v47  ;;  %v1026_v38 = vpop.permute.xlu1 %1025  ;;  %v1173_v33 = vld [vmem:[#allocation4 + $0x168] sm:$0xff]  ;;  %v994_v23 = vld [vmem:[#allocation4 + $0x60] sm:$0xff] }
 0x369   : > { %1144 = vst [vmem:[%s2252_s3 + $0x20] sm:$0xff] %v1128_v49  ;;  %1193 = vst [vmem:[%s2252_s3 + $0x28] sm:$0xff] %v1177_v18  ;;  %v1083_v12 = vsub.f32 %v987_v24, %v1026_v38  ;;  %v1132_v20 = vsub.f32 %v1116_v44, %v1026_v38  ;;  %v1181_v50 = vsub.f32 %v1165_v19, %v1026_v38  ;;  %v1021_v26 = vpop.permute.xlu0 %1020  ;;  %v1172_v47 = vld [vmem:[#allocation4 + $0x160] sm:$0xff]  ;;  %v997_v38 = vld [vmem:[#allocation4 + $0x78] sm:$0xff] }
 0x36a   : > { %v1082_v36 = vsub.f32 %v986_v25, %v1021_v26  ;;  %v1131_v21 = vsub.f32 %v1115_v62, %v1021_v26  ;;  %v1180_v37 = vsub.f32 %v1164_v34, %v1021_v26  ;;  %v1125_v26 = vld [vmem:[#allocation4 + $0xf0] sm:$0xff] }
 0x36b   : > { %1099 = vst [vmem:[%s2252_s3 + $0x78] sm:$0xff] %v1083_v12  ;;  %1148 = vst [vmem:[%s2252_s3 + $0x80] sm:$0xff] %v1132_v20  ;;  %v1126_v12 = vld [vmem:[#allocation4 + $0xf8] sm:$0xff] }
 0x36c   : > { %1197 = vst [vmem:[%s2252_s3 + $0x88] sm:$0xff] %v1181_v50  ;;  %1098 = vst [vmem:[%s2252_s3 + $0x60] sm:$0xff] %v1082_v36  ;;  %v1036_v40 = vpop.permute.xlu1 %1035  ;;  %v1175_v20 = vld [vmem:[#allocation4 + $0x178] sm:$0xff]  ;;  %v996_v50 = vld [vmem:[#allocation4 + $0x70] sm:$0xff] }
 0x36d   : > { %1147 = vst [vmem:[%s2252_s3 + $0x68] sm:$0xff] %v1131_v21  ;;  %1196 = vst [vmem:[%s2252_s3 + $0x70] sm:$0xff] %v1180_v37  ;;  %v1085_v52 = vsub.f32 %v989_v54, %v1036_v40  ;;  %v1134_v13 = vsub.f32 %v1118_v4, %v1036_v40  ;;  %v1183_v28 = vsub.f32 %v1167_v27, %v1036_v40  ;;  %v1031_v57 = vpop.permute.xlu0 %1030  ;;  %v1174_v36 = vld [vmem:[#allocation4 + $0x170] sm:$0xff] }
 0x36e   : > { %v1084_v31 = vsub.f32 %v988_v39, %v1031_v57  ;;  %v1133_v35 = vsub.f32 %v1117_v41, %v1031_v57  ;;  %v1182_v58 = vsub.f32 %v1166_v53, %v1031_v57 }
 0x36f   : > { %1101 = vst [vmem:[%s2252_s3 + $0xa8] sm:$0xff] %v1085_v52  ;;  %1150 = vst [vmem:[%s2252_s3 + $0xb0] sm:$0xff] %v1134_v13 }
 0x370   : > { %1199 = vst [vmem:[%s2252_s3 + $0xb8] sm:$0xff] %v1183_v28  ;;  %1100 = vst [vmem:[%s2252_s3 + $0x90] sm:$0xff] %v1084_v31  ;;  %v1046_v30 = vpop.permute.xlu1 %1045 }
 0x371   : > { %1149 = vst [vmem:[%s2252_s3 + $0x98] sm:$0xff] %v1133_v35  ;;  %1198 = vst [vmem:[%s2252_s3 + $0xa0] sm:$0xff] %v1182_v58  ;;  %v1087_v46 = vsub.f32 %v991_v48, %v1046_v30  ;;  %v1136_v56 = vsub.f32 %v1120_v43, %v1046_v30  ;;  %v1185_v14 = vsub.f32 %v1169_v55, %v1046_v30  ;;  %v1041_v61 = vpop.permute.xlu0 %1040 }
 0x372   : > { %v1086_v60 = vsub.f32 %v990_v51, %v1041_v61  ;;  %v1135_v0 = vsub.f32 %v1119_v42, %v1041_v61  ;;  %v1184_v1 = vsub.f32 %v1168_v29, %v1041_v61 }
 0x373   : > { %1103 = vst [vmem:[%s2252_s3 + $0xd8] sm:$0xff] %v1087_v46  ;;  %1152 = vst [vmem:[%s2252_s3 + $0xe0] sm:$0xff] %v1136_v56 }
 0x374   : > { %1201 = vst [vmem:[%s2252_s3 + $0xe8] sm:$0xff] %v1185_v14  ;;  %1102 = vst [vmem:[%s2252_s3 + $0xc0] sm:$0xff] %v1086_v60  ;;  %v1056_v9 = vpop.permute.xlu1 %1055 }
 0x375   : > { %1151 = vst [vmem:[%s2252_s3 + $0xc8] sm:$0xff] %v1135_v0  ;;  %1200 = vst [vmem:[%s2252_s3 + $0xd0] sm:$0xff] %v1184_v1  ;;  %v1089_v63 = vsub.f32 %v993_v3, %v1056_v9  ;;  %v1138_v11 = vsub.f32 %v1122_v5, %v1056_v9  ;;  %v1187_v2 = vsub.f32 %v1171_v59, %v1056_v9  ;;  %v1051_v8 = vpop.permute.xlu0 %1050 }
 0x376   : > { %v1088_v17 = vsub.f32 %v992_v15, %v1051_v8  ;;  %v1137_v32 = vsub.f32 %v1121_v22, %v1051_v8  ;;  %v1186_v45 = vsub.f32 %v1170_v6, %v1051_v8 }
 0x377   : > { %1105 = vst [vmem:[%s2252_s3 + $0x108] sm:$0xff] %v1089_v63  ;;  %1154 = vst [vmem:[%s2252_s3 + $0x110] sm:$0xff] %v1138_v11 }
 0x378   : > { %1203 = vst [vmem:[%s2252_s3 + $0x118] sm:$0xff] %v1187_v2  ;;  %1104 = vst [vmem:[%s2252_s3 + $0xf0] sm:$0xff] %v1088_v17  ;;  %v1066_v49 = vpop.permute.xlu1 %1065 }
 0x379   : > { %1153 = vst [vmem:[%s2252_s3 + $0xf8] sm:$0xff] %v1137_v32  ;;  %1202 = vst [vmem:[%s2252_s3 + $0x100] sm:$0xff] %v1186_v45  ;;  %v1091_v18 = vsub.f32 %v995_v10, %v1066_v49  ;;  %v1140_v24 = vsub.f32 %v1124_v16, %v1066_v49  ;;  %v1189_v44 = vsub.f32 %v1173_v33, %v1066_v49  ;;  %v1061_v19 = vpop.permute.xlu0 %1060 }
 0x37a   : > { %v1090_v25 = vsub.f32 %v994_v23, %v1061_v19  ;;  %v1139_v62 = vsub.f32 %v1123_v7, %v1061_v19  ;;  %v1188_v34 = vsub.f32 %v1172_v47, %v1061_v19 }
 0x37b   : > { %1107 = vst [vmem:[%s2252_s3 + $0x138] sm:$0xff] %v1091_v18  ;;  %1156 = vst [vmem:[%s2252_s3 + $0x140] sm:$0xff] %v1140_v24 }
 0x37c   : > { %1205 = vst [vmem:[%s2252_s3 + $0x148] sm:$0xff] %v1189_v44  ;;  %1106 = vst [vmem:[%s2252_s3 + $0x120] sm:$0xff] %v1090_v25  ;;  %v1076_v21 = vpop.permute.xlu1 %1075 }
 0x37d   : > { %1155 = vst [vmem:[%s2252_s3 + $0x128] sm:$0xff] %v1139_v62  ;;  %1204 = vst [vmem:[%s2252_s3 + $0x130] sm:$0xff] %v1188_v34  ;;  %v1093_v37 = vsub.f32 %v997_v38, %v1076_v21  ;;  %v1142_v54 = vsub.f32 %v1126_v12, %v1076_v21  ;;  %v1191_v4 = vsub.f32 %v1175_v20, %v1076_v21  ;;  %v1071_v27 = vpop.permute.xlu0 %1070 }
 0x37e   : > { %v1092_v39 = vsub.f32 %v996_v50, %v1071_v27  ;;  %v1141_v41 = vsub.f32 %v1125_v26, %v1071_v27  ;;  %v1190_v53 = vsub.f32 %v1174_v36, %v1071_v27 }
 0x37f   : > { %1109 = vst [vmem:[%s2252_s3 + $0x168] sm:$0xff] %v1093_v37  ;;  %1158 = vst [vmem:[%s2252_s3 + $0x170] sm:$0xff] %v1142_v54 }
 0x380   : > { %1207 = vst [vmem:[%s2252_s3 + $0x178] sm:$0xff] %v1191_v4  ;;  %1108 = vst [vmem:[%s2252_s3 + $0x150] sm:$0xff] %v1092_v39 }
 0x381   : > { %1157 = vst [vmem:[%s2252_s3 + $0x158] sm:$0xff] %v1141_v41  ;;  %1206 = vst [vmem:[%s2252_s3 + $0x160] sm:$0xff] %v1190_v53 }
 0x382 PF: > { %s13_s16 = sadd.s32 1, %s1578_s16   ;;  %s2268_s12 = smov %s1566_s13 }
 0x383   : > { %p10_p12 = scmp.ge.s32.totalorder %s13_s16, 5   ;;  %s2269_s13 = smov %s1639_s20 }
 0x384   : > { %s2270_s14 = smov %s1574_s15  ;;  %s2271_s15 = smov %s2273_s17 }
 0x385   :  { %12 = sbr.rel (!%p10_p12) target bundleno = 3 (0x3), region = 122 }

</bundles_post_ra>
